<compile_context>
chip_gen: v7x
topology: tpu7x:2x2x1
jax: 0.10.0
libtpu: 0.0.40
codegen_flags: <defaults>
</compile_context>

<pallas_src>
import jax
import jax.numpy as jnp
from jax import lax
from jax.experimental import pallas as pl
from jax.experimental.pallas import tpu as pltpu

# ------------------------- config (small synthetic shapes) -------------------------
B = 2
C_IN = 4
H = W = 16
PATCH = 4
K_OBJ = (H // PATCH) * (W // PATCH)      # 16 "detection tokens"
P_DIM = C_IN * PATCH * PATCH             # 64 flattened patch features
V_DIM = 32                               # hidden size (last_hidden_state dim)
N_CLASSES = 9                            # num_labels + 1 ("no object" is last)
THRESHOLD = 0.7
MAX_OBJECTS = 8


# ------------------- fused kernel: head + softmax-max + top-k + gather -------------
def detection_kernel(tok_ref, we_ref, wc_ref, out_ref):
    # tok_ref : [K_OBJ, P_DIM]   (this batch's patch tokens)
    # we_ref  : [P_DIM, V_DIM]   patch-embedding weight (VMEM-resident across grid)
    # wc_ref  : [V_DIM, N_CLASSES] classifier weight
    # out_ref : [MAX_OBJECTS, V_DIM]
    hid = jnp.dot(tok_ref[...], we_ref[...],
                  preferred_element_type=jnp.float32)                  # [K, V]
    logits = jnp.dot(hid, wc_ref[...],
                     preferred_element_type=jnp.float32)               # [K, C]

    # --- per-token max softmax prob over non-"no object" classes (no probs tile) ---
    m = jnp.max(logits, axis=-1, keepdims=True)                        # [K, 1]
    denom = jnp.sum(jnp.exp(logits - m), axis=-1, keepdims=True)       # [K, 1]
    cls_iota = lax.broadcasted_iota(jnp.int32, (K_OBJ, N_CLASSES), 1)
    obj_logits = jnp.where(cls_iota < N_CLASSES - 1, logits, -jnp.inf)
    obj_max = jnp.max(obj_logits, axis=-1, keepdims=True)              # [K, 1]
    maxp = jnp.exp(obj_max - m) * pl.reciprocal(denom, approx=True)    # [K, 1]

    # --- iterative top-MAX_OBJECTS: masked one-hot selection matrix S [M, K] -------
    # Tie-break: smallest token index first (stable descending order).
    tok_iota = lax.broadcasted_iota(jnp.int32, (K_OBJ, 1), 0)
    row_iota = lax.broadcasted_iota(jnp.int32, (MAX_OBJECTS, K_OBJ), 0)
    col_iota = lax.broadcasted_iota(jnp.int32, (MAX_OBJECTS, K_OBJ), 1)
    sel = jnp.zeros((MAX_OBJECTS, K_OBJ), jnp.float32)
    mp = maxp
    for r in range(MAX_OBJECTS):                 # static unroll; MAX_OBJECTS is small
        cur = jnp.max(mp)                                              # scalar
        idx = jnp.min(jnp.where(mp == cur, tok_iota, K_OBJ))           # scalar int32
        keep = (cur >= THRESHOLD).astype(jnp.float32)                  # threshold mask
        sel = sel + jnp.where((row_iota == r) & (col_iota == idx), keep, 0.0)
        mp = jnp.where(tok_iota == idx, -jnp.inf, mp)

    # --- one-hot MXU gather + threshold mask in a single dot -----------------------
    out_ref[...] = jnp.dot(sel, hid, preferred_element_type=jnp.float32)


def object_detection_head(tokens, w_embed, w_cls):
    # tokens: [B, K_OBJ, P_DIM]
    grid_spec = pltpu.PrefetchScalarGridSpec(
        num_scalar_prefetch=0,
        grid=(B,),
        in_specs=[
            pl.BlockSpec((None, K_OBJ, P_DIM), lambda b: (b, 0, 0)),
            pl.BlockSpec((P_DIM, V_DIM), lambda b: (0, 0)),      # stays resident
            pl.BlockSpec((V_DIM, N_CLASSES), lambda b: (0, 0)),  # stays resident
        ],
        out_specs=pl.BlockSpec((None, MAX_OBJECTS, V_DIM), lambda b: (b, 0, 0)),
    )
    return pl.pallas_call(
        detection_kernel,
        grid_spec=grid_spec,
        out_shape=jax.ShapeDtypeStruct((B, MAX_OBJECTS, V_DIM), jnp.float32),
        compiler_params=pltpu.CompilerParams(
            dimension_semantics=("parallel",)),   # batches independent (v7x 2 TCs)
    )(tokens, w_embed, w_cls)


# ------------------------- wrapper = ObjectDetectionModel.forward ------------------
def object_detection_forward(pixel_values, w_embed, w_cls):
    # TODO(synk): pretrained YolosForObjectDetection backbone replaced by a synthetic
    # patch-embedding + classifier head (weights below); post-processing is exact.
    b, c, h, w = pixel_values.shape
    # NCHW -> non-overlapping patch tokens [B, K_OBJ, C*PATCH*PATCH]  (layout glue)
    x = pixel_values.reshape(b, c, h // PATCH, PATCH, w // PATCH, PATCH)
    x = x.transpose(0, 2, 4, 1, 3, 5)
    tokens = x.reshape(b, K_OBJ, P_DIM).astype(jnp.float32)
    return object_detection_head(tokens, w_embed, w_cls)    # [B, MAX_OBJECTS, V_DIM]


# ------------------------------------- main ----------------------------------------
if __name__ == "__main__":
    key = jax.random.PRNGKey(0)
    k1, k2, k3 = jax.random.split(key, 3)
    # features (pixel_values), NCHW as in PyTorch
    pixel_values = jax.random.normal(k1, (B, C_IN, H, W), dtype=jnp.float32)
    # deterministic synthetic parameters (f32 everywhere; bf16 only helps on v6e/v7x MXU)
    w_embed = jax.random.normal(k2, (P_DIM, V_DIM), dtype=jnp.float32) * 0.05
    w_cls = jax.random.normal(k3, (V_DIM, N_CLASSES), dtype=jnp.float32)

    out = object_detection_forward(pixel_values, w_embed, w_cls)
    out = jax.block_until_ready(out)
    assert out.shape == (B, MAX_OBJECTS, V_DIM), out.shape
    print("KERNEL_OK")
</pallas_src>

<mosaic_0001>
module attributes {stable_mosaic.version = 11 : i64} {
  func.func @detection_kernel(%arg0: i32, %arg1: memref<1x16x64xf32, #tpu.memory_space<vmem>>, %arg2: memref<64x32xf32, #tpu.memory_space<vmem>>, %arg3: memref<32x9xf32, #tpu.memory_space<vmem>>, %arg4: memref<1x8x32xf32, #tpu.memory_space<vmem>>) attributes {dimension_semantics = [#tpu.dimension_semantics<parallel>], iteration_bounds = array<i64: 2>, scalar_prefetch = 0 : i64, scratch_operands = 0 : i64, tpu.core_type = #tpu.core_type<tc>, window_params = [{transform_indices = @transform_0, window_bounds = array<i64: 1, 16, 64>}, {pipeline_mode = #tpu.pipeline_mode<synchronous>, transform_indices = @transform_1, window_bounds = array<i64: 64, 32>}, {pipeline_mode = #tpu.pipeline_mode<synchronous>, transform_indices = @transform_2, window_bounds = array<i64: 32, 9>}, {transform_indices = @transform_3, window_bounds = array<i64: 1, 8, 32>}]} {
    %c0 = arith.constant 0 : index
    %c0_0 = arith.constant 0 : index
    %c0_1 = arith.constant 0 : index
    %0 = vector.load %arg1[%c0, %c0_0, %c0_1] : memref<1x16x64xf32, #tpu.memory_space<vmem>>, vector<1x16x64xf32>
    %1 = vector.shape_cast %0 : vector<1x16x64xf32> to vector<16x64xf32>
    %c0_2 = arith.constant 0 : index
    %c0_3 = arith.constant 0 : index
    %2 = vector.load %arg2[%c0_2, %c0_3] : memref<64x32xf32, #tpu.memory_space<vmem>>, vector<64x32xf32>
    %cst = arith.constant dense<0.000000e+00> : vector<16x32xf32>
    %3 = tpu.matmul %1, %2, %cst {dimension_numbers = #tpu.dot_dimension_numbers<[1], [0], [0], [1], [0, 0, 1, 1], [], []>} : vector<16x64xf32>, vector<64x32xf32>, vector<16x32xf32> -> vector<16x32xf32>
    %c0_4 = arith.constant 0 : index
    %c0_5 = arith.constant 0 : index
    %4 = vector.load %arg3[%c0_4, %c0_5] : memref<32x9xf32, #tpu.memory_space<vmem>>, vector<32x9xf32>
    %cst_6 = arith.constant dense<0.000000e+00> : vector<16x9xf32>
    %5 = tpu.matmul %3, %4, %cst_6 {dimension_numbers = #tpu.dot_dimension_numbers<[1], [0], [0], [1], [0, 0, 1, 1], [], []>} : vector<16x32xf32>, vector<32x9xf32>, vector<16x9xf32> -> vector<16x9xf32>
    %cst_7 = arith.constant dense<0xFF800000> : vector<16xf32>
    %6 = vector.multi_reduction <maximumf>, %5, %cst_7 [1] : vector<16x9xf32> to vector<16xf32>
    %7 = vector.shape_cast %6 : vector<16xf32> to vector<16x1xf32>
    %8 = vector.broadcast %7 : vector<16x1xf32> to vector<16x9xf32>
    %9 = arith.subf %5, %8 : vector<16x9xf32>
    %10 = math.exp %9 : vector<16x9xf32>
    %cst_8 = arith.constant dense<0.000000e+00> : vector<16xf32>
    %11 = vector.multi_reduction <add>, %10, %cst_8 [1] : vector<16x9xf32> to vector<16xf32>
    %12 = vector.shape_cast %11 : vector<16xf32> to vector<16x1xf32>
    %13 = tpu.iota {dimensions = array<i32: 1>} : vector<16x9xi32>
    %c8_i32 = arith.constant 8 : i32
    %14 = vector.broadcast %c8_i32 : i32 to vector<16x9xi32>
    %15 = arith.cmpi slt, %13, %14 : vector<16x9xi32>
    %cst_9 = arith.constant 0xFF800000 : f32
    %16 = vector.broadcast %cst_9 : f32 to vector<16x9xf32>
    %17 = arith.select %15, %5, %16 : vector<16x9xi1>, vector<16x9xf32>
    %cst_10 = arith.constant dense<0xFF800000> : vector<16xf32>
    %18 = vector.multi_reduction <maximumf>, %17, %cst_10 [1] : vector<16x9xf32> to vector<16xf32>
    %19 = vector.shape_cast %18 : vector<16xf32> to vector<16x1xf32>
    %20 = arith.subf %19, %7 : vector<16x1xf32>
    %21 = math.exp %20 : vector<16x1xf32>
    %22 = tpu.reciprocal %12 {approx = true} : vector<16x1xf32> -> vector<16x1xf32>
    %23 = arith.mulf %21, %22 : vector<16x1xf32>
    %24 = tpu.iota {dimensions = array<i32: 0>} : vector<16x1xi32>
    %25 = tpu.iota {dimensions = array<i32: 0>} : vector<8x16xi32>
    %26 = tpu.iota {dimensions = array<i32: 1>} : vector<8x16xi32>
    %cst_11 = arith.constant 0.000000e+00 : f32
    %27 = vector.broadcast %cst_11 : f32 to vector<8x16xf32>
    %28 = vector.shape_cast %23 : vector<16x1xf32> to vector<1x16x1xf32>
    %cst_12 = arith.constant dense<0xFF800000> : vector<1xf32>
    %29 = vector.multi_reduction <maximumf>, %28, %cst_12 [1, 2] : vector<1x16x1xf32> to vector<1xf32>
    %30 = vector.shape_cast %29 : vector<1xf32> to vector<1x1x1xf32>
    %31 = vector.extract %30[0, 0, 0] : f32 from vector<1x1x1xf32>
    %32 = vector.broadcast %31 : f32 to vector<16x1xf32>
    %33 = arith.cmpf oeq, %23, %32 : vector<16x1xf32>
    %c16_i32 = arith.constant 16 : i32
    %34 = vector.broadcast %c16_i32 : i32 to vector<16x1xi32>
    %35 = arith.select %33, %24, %34 : vector<16x1xi1>, vector<16x1xi32>
    %36 = vector.shape_cast %35 : vector<16x1xi32> to vector<1x16x1xi32>
    %cst_13 = arith.constant dense<2147483647> : vector<1xi32>
    %37 = vector.multi_reduction <minsi>, %36, %cst_13 [1, 2] : vector<1x16x1xi32> to vector<1xi32>
    %38 = vector.shape_cast %37 : vector<1xi32> to vector<1x1x1xi32>
    %39 = vector.extract %38[0, 0, 0] : i32 from vector<1x1x1xi32>
    %cst_14 = arith.constant 0.699999988 : f32
    %40 = arith.cmpf oge, %31, %cst_14 : f32
    %41 = arith.extui %40 : i1 to i32
    %42 = arith.sitofp %41 : i32 to f32
    %c0_i32 = arith.constant 0 : i32
    %43 = vector.broadcast %c0_i32 : i32 to vector<8x16xi32>
    %44 = arith.cmpi eq, %25, %43 : vector<8x16xi32>
    %45 = vector.broadcast %39 : i32 to vector<8x16xi32>
    %46 = arith.cmpi eq, %26, %45 : vector<8x16xi32>
    %47 = arith.andi %44, %46 : vector<8x16xi1>
    %cst_15 = arith.constant 0.000000e+00 : f32
    %48 = vector.broadcast %42 : f32 to vector<8x16xf32>
    %49 = vector.broadcast %cst_15 : f32 to vector<8x16xf32>
    %50 = arith.select %47, %48, %49 : vector<8x16xi1>, vector<8x16xf32>
    %51 = arith.addf %27, %50 : vector<8x16xf32>
    %52 = vector.broadcast %39 : i32 to vector<16x1xi32>
    %53 = arith.cmpi eq, %24, %52 : vector<16x1xi32>
    %cst_16 = arith.constant 0xFF800000 : f32
    %54 = vector.broadcast %cst_16 : f32 to vector<16x1xf32>
    %55 = arith.select %53, %54, %23 : vector<16x1xi1>, vector<16x1xf32>
    %56 = vector.shape_cast %55 : vector<16x1xf32> to vector<1x16x1xf32>
    %cst_17 = arith.constant dense<0xFF800000> : vector<1xf32>
    %57 = vector.multi_reduction <maximumf>, %56, %cst_17 [1, 2] : vector<1x16x1xf32> to vector<1xf32>
    %58 = vector.shape_cast %57 : vector<1xf32> to vector<1x1x1xf32>
    %59 = vector.extract %58[0, 0, 0] : f32 from vector<1x1x1xf32>
    %60 = vector.broadcast %59 : f32 to vector<16x1xf32>
    %61 = arith.cmpf oeq, %55, %60 : vector<16x1xf32>
    %c16_i32_18 = arith.constant 16 : i32
    %62 = vector.broadcast %c16_i32_18 : i32 to vector<16x1xi32>
    %63 = arith.select %61, %24, %62 : vector<16x1xi1>, vector<16x1xi32>
    %64 = vector.shape_cast %63 : vector<16x1xi32> to vector<1x16x1xi32>
    %cst_19 = arith.constant dense<2147483647> : vector<1xi32>
    %65 = vector.multi_reduction <minsi>, %64, %cst_19 [1, 2] : vector<1x16x1xi32> to vector<1xi32>
    %66 = vector.shape_cast %65 : vector<1xi32> to vector<1x1x1xi32>
    %67 = vector.extract %66[0, 0, 0] : i32 from vector<1x1x1xi32>
    %cst_20 = arith.constant 0.699999988 : f32
    %68 = arith.cmpf oge, %59, %cst_20 : f32
    %69 = arith.extui %68 : i1 to i32
    %70 = arith.sitofp %69 : i32 to f32
    %c1_i32 = arith.constant 1 : i32
    %71 = vector.broadcast %c1_i32 : i32 to vector<8x16xi32>
    %72 = arith.cmpi eq, %25, %71 : vector<8x16xi32>
    %73 = vector.broadcast %67 : i32 to vector<8x16xi32>
    %74 = arith.cmpi eq, %26, %73 : vector<8x16xi32>
    %75 = arith.andi %72, %74 : vector<8x16xi1>
    %cst_21 = arith.constant 0.000000e+00 : f32
    %76 = vector.broadcast %70 : f32 to vector<8x16xf32>
    %77 = vector.broadcast %cst_21 : f32 to vector<8x16xf32>
    %78 = arith.select %75, %76, %77 : vector<8x16xi1>, vector<8x16xf32>
    %79 = arith.addf %51, %78 : vector<8x16xf32>
    %80 = vector.broadcast %67 : i32 to vector<16x1xi32>
    %81 = arith.cmpi eq, %24, %80 : vector<16x1xi32>
    %cst_22 = arith.constant 0xFF800000 : f32
    %82 = vector.broadcast %cst_22 : f32 to vector<16x1xf32>
    %83 = arith.select %81, %82, %55 : vector<16x1xi1>, vector<16x1xf32>
    %84 = vector.shape_cast %83 : vector<16x1xf32> to vector<1x16x1xf32>
    %cst_23 = arith.constant dense<0xFF800000> : vector<1xf32>
    %85 = vector.multi_reduction <maximumf>, %84, %cst_23 [1, 2] : vector<1x16x1xf32> to vector<1xf32>
    %86 = vector.shape_cast %85 : vector<1xf32> to vector<1x1x1xf32>
    %87 = vector.extract %86[0, 0, 0] : f32 from vector<1x1x1xf32>
    %88 = vector.broadcast %87 : f32 to vector<16x1xf32>
    %89 = arith.cmpf oeq, %83, %88 : vector<16x1xf32>
    %c16_i32_24 = arith.constant 16 : i32
    %90 = vector.broadcast %c16_i32_24 : i32 to vector<16x1xi32>
    %91 = arith.select %89, %24, %90 : vector<16x1xi1>, vector<16x1xi32>
    %92 = vector.shape_cast %91 : vector<16x1xi32> to vector<1x16x1xi32>
    %cst_25 = arith.constant dense<2147483647> : vector<1xi32>
    %93 = vector.multi_reduction <minsi>, %92, %cst_25 [1, 2] : vector<1x16x1xi32> to vector<1xi32>
    %94 = vector.shape_cast %93 : vector<1xi32> to vector<1x1x1xi32>
    %95 = vector.extract %94[0, 0, 0] : i32 from vector<1x1x1xi32>
    %cst_26 = arith.constant 0.699999988 : f32
    %96 = arith.cmpf oge, %87, %cst_26 : f32
    %97 = arith.extui %96 : i1 to i32
    %98 = arith.sitofp %97 : i32 to f32
    %c2_i32 = arith.constant 2 : i32
    %99 = vector.broadcast %c2_i32 : i32 to vector<8x16xi32>
    %100 = arith.cmpi eq, %25, %99 : vector<8x16xi32>
    %101 = vector.broadcast %95 : i32 to vector<8x16xi32>
    %102 = arith.cmpi eq, %26, %101 : vector<8x16xi32>
    %103 = arith.andi %100, %102 : vector<8x16xi1>
    %cst_27 = arith.constant 0.000000e+00 : f32
    %104 = vector.broadcast %98 : f32 to vector<8x16xf32>
    %105 = vector.broadcast %cst_27 : f32 to vector<8x16xf32>
    %106 = arith.select %103, %104, %105 : vector<8x16xi1>, vector<8x16xf32>
    %107 = arith.addf %79, %106 : vector<8x16xf32>
    %108 = vector.broadcast %95 : i32 to vector<16x1xi32>
    %109 = arith.cmpi eq, %24, %108 : vector<16x1xi32>
    %cst_28 = arith.constant 0xFF800000 : f32
    %110 = vector.broadcast %cst_28 : f32 to vector<16x1xf32>
    %111 = arith.select %109, %110, %83 : vector<16x1xi1>, vector<16x1xf32>
    %112 = vector.shape_cast %111 : vector<16x1xf32> to vector<1x16x1xf32>
    %cst_29 = arith.constant dense<0xFF800000> : vector<1xf32>
    %113 = vector.multi_reduction <maximumf>, %112, %cst_29 [1, 2] : vector<1x16x1xf32> to vector<1xf32>
    %114 = vector.shape_cast %113 : vector<1xf32> to vector<1x1x1xf32>
    %115 = vector.extract %114[0, 0, 0] : f32 from vector<1x1x1xf32>
    %116 = vector.broadcast %115 : f32 to vector<16x1xf32>
    %117 = arith.cmpf oeq, %111, %116 : vector<16x1xf32>
    %c16_i32_30 = arith.constant 16 : i32
    %118 = vector.broadcast %c16_i32_30 : i32 to vector<16x1xi32>
    %119 = arith.select %117, %24, %118 : vector<16x1xi1>, vector<16x1xi32>
    %120 = vector.shape_cast %119 : vector<16x1xi32> to vector<1x16x1xi32>
    %cst_31 = arith.constant dense<2147483647> : vector<1xi32>
    %121 = vector.multi_reduction <minsi>, %120, %cst_31 [1, 2] : vector<1x16x1xi32> to vector<1xi32>
    %122 = vector.shape_cast %121 : vector<1xi32> to vector<1x1x1xi32>
    %123 = vector.extract %122[0, 0, 0] : i32 from vector<1x1x1xi32>
    %cst_32 = arith.constant 0.699999988 : f32
    %124 = arith.cmpf oge, %115, %cst_32 : f32
    %125 = arith.extui %124 : i1 to i32
    %126 = arith.sitofp %125 : i32 to f32
    %c3_i32 = arith.constant 3 : i32
    %127 = vector.broadcast %c3_i32 : i32 to vector<8x16xi32>
    %128 = arith.cmpi eq, %25, %127 : vector<8x16xi32>
    %129 = vector.broadcast %123 : i32 to vector<8x16xi32>
    %130 = arith.cmpi eq, %26, %129 : vector<8x16xi32>
    %131 = arith.andi %128, %130 : vector<8x16xi1>
    %cst_33 = arith.constant 0.000000e+00 : f32
    %132 = vector.broadcast %126 : f32 to vector<8x16xf32>
    %133 = vector.broadcast %cst_33 : f32 to vector<8x16xf32>
    %134 = arith.select %131, %132, %133 : vector<8x16xi1>, vector<8x16xf32>
    %135 = arith.addf %107, %134 : vector<8x16xf32>
    %136 = vector.broadcast %123 : i32 to vector<16x1xi32>
    %137 = arith.cmpi eq, %24, %136 : vector<16x1xi32>
    %cst_34 = arith.constant 0xFF800000 : f32
    %138 = vector.broadcast %cst_34 : f32 to vector<16x1xf32>
    %139 = arith.select %137, %138, %111 : vector<16x1xi1>, vector<16x1xf32>
    %140 = vector.shape_cast %139 : vector<16x1xf32> to vector<1x16x1xf32>
    %cst_35 = arith.constant dense<0xFF800000> : vector<1xf32>
    %141 = vector.multi_reduction <maximumf>, %140, %cst_35 [1, 2] : vector<1x16x1xf32> to vector<1xf32>
    %142 = vector.shape_cast %141 : vector<1xf32> to vector<1x1x1xf32>
    %143 = vector.extract %142[0, 0, 0] : f32 from vector<1x1x1xf32>
    %144 = vector.broadcast %143 : f32 to vector<16x1xf32>
    %145 = arith.cmpf oeq, %139, %144 : vector<16x1xf32>
    %c16_i32_36 = arith.constant 16 : i32
    %146 = vector.broadcast %c16_i32_36 : i32 to vector<16x1xi32>
    %147 = arith.select %145, %24, %146 : vector<16x1xi1>, vector<16x1xi32>
    %148 = vector.shape_cast %147 : vector<16x1xi32> to vector<1x16x1xi32>
    %cst_37 = arith.constant dense<2147483647> : vector<1xi32>
    %149 = vector.multi_reduction <minsi>, %148, %cst_37 [1, 2] : vector<1x16x1xi32> to vector<1xi32>
    %150 = vector.shape_cast %149 : vector<1xi32> to vector<1x1x1xi32>
    %151 = vector.extract %150[0, 0, 0] : i32 from vector<1x1x1xi32>
    %cst_38 = arith.constant 0.699999988 : f32
    %152 = arith.cmpf oge, %143, %cst_38 : f32
    %153 = arith.extui %152 : i1 to i32
    %154 = arith.sitofp %153 : i32 to f32
    %c4_i32 = arith.constant 4 : i32
    %155 = vector.broadcast %c4_i32 : i32 to vector<8x16xi32>
    %156 = arith.cmpi eq, %25, %155 : vector<8x16xi32>
    %157 = vector.broadcast %151 : i32 to vector<8x16xi32>
    %158 = arith.cmpi eq, %26, %157 : vector<8x16xi32>
    %159 = arith.andi %156, %158 : vector<8x16xi1>
    %cst_39 = arith.constant 0.000000e+00 : f32
    %160 = vector.broadcast %154 : f32 to vector<8x16xf32>
    %161 = vector.broadcast %cst_39 : f32 to vector<8x16xf32>
    %162 = arith.select %159, %160, %161 : vector<8x16xi1>, vector<8x16xf32>
    %163 = arith.addf %135, %162 : vector<8x16xf32>
    %164 = vector.broadcast %151 : i32 to vector<16x1xi32>
    %165 = arith.cmpi eq, %24, %164 : vector<16x1xi32>
    %cst_40 = arith.constant 0xFF800000 : f32
    %166 = vector.broadcast %cst_40 : f32 to vector<16x1xf32>
    %167 = arith.select %165, %166, %139 : vector<16x1xi1>, vector<16x1xf32>
    %168 = vector.shape_cast %167 : vector<16x1xf32> to vector<1x16x1xf32>
    %cst_41 = arith.constant dense<0xFF800000> : vector<1xf32>
    %169 = vector.multi_reduction <maximumf>, %168, %cst_41 [1, 2] : vector<1x16x1xf32> to vector<1xf32>
    %170 = vector.shape_cast %169 : vector<1xf32> to vector<1x1x1xf32>
    %171 = vector.extract %170[0, 0, 0] : f32 from vector<1x1x1xf32>
    %172 = vector.broadcast %171 : f32 to vector<16x1xf32>
    %173 = arith.cmpf oeq, %167, %172 : vector<16x1xf32>
    %c16_i32_42 = arith.constant 16 : i32
    %174 = vector.broadcast %c16_i32_42 : i32 to vector<16x1xi32>
    %175 = arith.select %173, %24, %174 : vector<16x1xi1>, vector<16x1xi32>
    %176 = vector.shape_cast %175 : vector<16x1xi32> to vector<1x16x1xi32>
    %cst_43 = arith.constant dense<2147483647> : vector<1xi32>
    %177 = vector.multi_reduction <minsi>, %176, %cst_43 [1, 2] : vector<1x16x1xi32> to vector<1xi32>
    %178 = vector.shape_cast %177 : vector<1xi32> to vector<1x1x1xi32>
    %179 = vector.extract %178[0, 0, 0] : i32 from vector<1x1x1xi32>
    %cst_44 = arith.constant 0.699999988 : f32
    %180 = arith.cmpf oge, %171, %cst_44 : f32
    %181 = arith.extui %180 : i1 to i32
    %182 = arith.sitofp %181 : i32 to f32
    %c5_i32 = arith.constant 5 : i32
    %183 = vector.broadcast %c5_i32 : i32 to vector<8x16xi32>
    %184 = arith.cmpi eq, %25, %183 : vector<8x16xi32>
    %185 = vector.broadcast %179 : i32 to vector<8x16xi32>
    %186 = arith.cmpi eq, %26, %185 : vector<8x16xi32>
    %187 = arith.andi %184, %186 : vector<8x16xi1>
    %cst_45 = arith.constant 0.000000e+00 : f32
    %188 = vector.broadcast %182 : f32 to vector<8x16xf32>
    %189 = vector.broadcast %cst_45 : f32 to vector<8x16xf32>
    %190 = arith.select %187, %188, %189 : vector<8x16xi1>, vector<8x16xf32>
    %191 = arith.addf %163, %190 : vector<8x16xf32>
    %192 = vector.broadcast %179 : i32 to vector<16x1xi32>
    %193 = arith.cmpi eq, %24, %192 : vector<16x1xi32>
    %cst_46 = arith.constant 0xFF800000 : f32
    %194 = vector.broadcast %cst_46 : f32 to vector<16x1xf32>
    %195 = arith.select %193, %194, %167 : vector<16x1xi1>, vector<16x1xf32>
    %196 = vector.shape_cast %195 : vector<16x1xf32> to vector<1x16x1xf32>
    %cst_47 = arith.constant dense<0xFF800000> : vector<1xf32>
    %197 = vector.multi_reduction <maximumf>, %196, %cst_47 [1, 2] : vector<1x16x1xf32> to vector<1xf32>
    %198 = vector.shape_cast %197 : vector<1xf32> to vector<1x1x1xf32>
    %199 = vector.extract %198[0, 0, 0] : f32 from vector<1x1x1xf32>
    %200 = vector.broadcast %199 : f32 to vector<16x1xf32>
    %201 = arith.cmpf oeq, %195, %200 : vector<16x1xf32>
    %c16_i32_48 = arith.constant 16 : i32
    %202 = vector.broadcast %c16_i32_48 : i32 to vector<16x1xi32>
    %203 = arith.select %201, %24, %202 : vector<16x1xi1>, vector<16x1xi32>
    %204 = vector.shape_cast %203 : vector<16x1xi32> to vector<1x16x1xi32>
    %cst_49 = arith.constant dense<2147483647> : vector<1xi32>
    %205 = vector.multi_reduction <minsi>, %204, %cst_49 [1, 2] : vector<1x16x1xi32> to vector<1xi32>
    %206 = vector.shape_cast %205 : vector<1xi32> to vector<1x1x1xi32>
    %207 = vector.extract %206[0, 0, 0] : i32 from vector<1x1x1xi32>
    %cst_50 = arith.constant 0.699999988 : f32
    %208 = arith.cmpf oge, %199, %cst_50 : f32
    %209 = arith.extui %208 : i1 to i32
    %210 = arith.sitofp %209 : i32 to f32
    %c6_i32 = arith.constant 6 : i32
    %211 = vector.broadcast %c6_i32 : i32 to vector<8x16xi32>
    %212 = arith.cmpi eq, %25, %211 : vector<8x16xi32>
    %213 = vector.broadcast %207 : i32 to vector<8x16xi32>
    %214 = arith.cmpi eq, %26, %213 : vector<8x16xi32>
    %215 = arith.andi %212, %214 : vector<8x16xi1>
    %cst_51 = arith.constant 0.000000e+00 : f32
    %216 = vector.broadcast %210 : f32 to vector<8x16xf32>
    %217 = vector.broadcast %cst_51 : f32 to vector<8x16xf32>
    %218 = arith.select %215, %216, %217 : vector<8x16xi1>, vector<8x16xf32>
    %219 = arith.addf %191, %218 : vector<8x16xf32>
    %220 = vector.broadcast %207 : i32 to vector<16x1xi32>
    %221 = arith.cmpi eq, %24, %220 : vector<16x1xi32>
    %cst_52 = arith.constant 0xFF800000 : f32
    %222 = vector.broadcast %cst_52 : f32 to vector<16x1xf32>
    %223 = arith.select %221, %222, %195 : vector<16x1xi1>, vector<16x1xf32>
    %224 = vector.shape_cast %223 : vector<16x1xf32> to vector<1x16x1xf32>
    %cst_53 = arith.constant dense<0xFF800000> : vector<1xf32>
    %225 = vector.multi_reduction <maximumf>, %224, %cst_53 [1, 2] : vector<1x16x1xf32> to vector<1xf32>
    %226 = vector.shape_cast %225 : vector<1xf32> to vector<1x1x1xf32>
    %227 = vector.extract %226[0, 0, 0] : f32 from vector<1x1x1xf32>
    %228 = vector.broadcast %227 : f32 to vector<16x1xf32>
    %229 = arith.cmpf oeq, %223, %228 : vector<16x1xf32>
    %c16_i32_54 = arith.constant 16 : i32
    %230 = vector.broadcast %c16_i32_54 : i32 to vector<16x1xi32>
    %231 = arith.select %229, %24, %230 : vector<16x1xi1>, vector<16x1xi32>
    %232 = vector.shape_cast %231 : vector<16x1xi32> to vector<1x16x1xi32>
    %cst_55 = arith.constant dense<2147483647> : vector<1xi32>
    %233 = vector.multi_reduction <minsi>, %232, %cst_55 [1, 2] : vector<1x16x1xi32> to vector<1xi32>
    %234 = vector.shape_cast %233 : vector<1xi32> to vector<1x1x1xi32>
    %235 = vector.extract %234[0, 0, 0] : i32 from vector<1x1x1xi32>
    %cst_56 = arith.constant 0.699999988 : f32
    %236 = arith.cmpf oge, %227, %cst_56 : f32
    %237 = arith.extui %236 : i1 to i32
    %238 = arith.sitofp %237 : i32 to f32
    %c7_i32 = arith.constant 7 : i32
    %239 = vector.broadcast %c7_i32 : i32 to vector<8x16xi32>
    %240 = arith.cmpi eq, %25, %239 : vector<8x16xi32>
    %241 = vector.broadcast %235 : i32 to vector<8x16xi32>
    %242 = arith.cmpi eq, %26, %241 : vector<8x16xi32>
    %243 = arith.andi %240, %242 : vector<8x16xi1>
    %cst_57 = arith.constant 0.000000e+00 : f32
    %244 = vector.broadcast %238 : f32 to vector<8x16xf32>
    %245 = vector.broadcast %cst_57 : f32 to vector<8x16xf32>
    %246 = arith.select %243, %244, %245 : vector<8x16xi1>, vector<8x16xf32>
    %247 = arith.addf %219, %246 : vector<8x16xf32>
    %cst_58 = arith.constant dense<0.000000e+00> : vector<8x32xf32>
    %248 = tpu.matmul %247, %3, %cst_58 {dimension_numbers = #tpu.dot_dimension_numbers<[1], [0], [0], [1], [0, 0, 1, 1], [], []>} : vector<8x16xf32>, vector<16x32xf32>, vector<8x32xf32> -> vector<8x32xf32>
    %c0_59 = arith.constant 0 : index
    %c0_60 = arith.constant 0 : index
    %c0_61 = arith.constant 0 : index
    %249 = vector.load %arg4[%c0_59, %c0_60, %c0_61] : memref<1x8x32xf32, #tpu.memory_space<vmem>>, vector<1x8x32xf32>
    %250 = vector.shape_cast %249 : vector<1x8x32xf32> to vector<8x32xf32>
    %251 = vector.shape_cast %248 : vector<8x32xf32> to vector<1x8x32xf32>
    tpu.vector_store %arg4[%c0_59, %c0_60, %c0_61], %251 {strides = array<i32>} : memref<1x8x32xf32, #tpu.memory_space<vmem>>, vector<1x8x32xf32>,
    return
  }
  func.func @transform_0(%arg0: i32) -> (i32, i32, i32) {
    %c0_i32 = arith.constant 0 : i32
    %c0_i32_0 = arith.constant 0 : i32
    %c0_i32_1 = arith.constant 0 : i32
    return %arg0, %c0_i32, %c0_i32_0 : i32, i32, i32
  }
  func.func @transform_1(%arg0: i32) -> (i32, i32) {
    %c0_i32 = arith.constant 0 : i32
    %c0_i32_0 = arith.constant 0 : i32
    %c0_i32_1 = arith.constant 0 : i32
    return %c0_i32, %c0_i32_0 : i32, i32
  }
  func.func @transform_2(%arg0: i32) -> (i32, i32) {
    %c0_i32 = arith.constant 0 : i32
    %c0_i32_0 = arith.constant 0 : i32
    %c0_i32_1 = arith.constant 0 : i32
    return %c0_i32, %c0_i32_0 : i32, i32
  }
  func.func @transform_3(%arg0: i32) -> (i32, i32, i32) {
    %c0_i32 = arith.constant 0 : i32
    %c0_i32_0 = arith.constant 0 : i32
    %c0_i32_1 = arith.constant 0 : i32
    return %arg0, %c0_i32, %c0_i32_0 : i32, i32, i32
  }
}

</mosaic_0001>

<bundles_post_ra>
// kernel: tpu_custom_call.1
= control target key start
LH: loop header
LB: loop body
LE: loop exit
PB: predicated region body
PF: predicated region fallthrough
CT: control target
= control target key end

     0   :  { %8 = vsyncpa [#allocation3], 0  ;;  %s1325_s0 = inlined_call_operand.vmem [shape: f32[2,16,64], index: 0, kind: input, shape index: {}]   ;;  %s1326_s1 = inlined_call_operand.vmem [shape: f32[64,32], index: 1, kind: input, shape index: {}]   ;;  %s1327_s2 = inlined_call_operand.vmem [shape: f32[32,9], index: 2, kind: input, shape index: {}]   ;;  %s1328_s3 = inlined_call_operand.hbm [shape: f32[2,8,32], index: 3, kind: output, shape index: {}]  }
   0x1   :  { %10 = vsyncpa [#allocation3 + $0x1], 0  ;;  %s1120_s12 = smov 0   ;;  %s1122_s13 = smov 0  }
   0x2   :  { %s1124_s14 = smov 0   ;;  %s1126_s15 = smov 0  }
   0x3 LB: > { %s1141_s16 = sadd.s32 4294967295, %s1094_s15   ;;  %s846_s17 = sadd.s32 4294967294, %s1094_s15   ;;  %s1094_s15 = sphi %s1126_s15, %s1334_s15   ;;  %s1090_s14 = sphi %s1124_s14, %s1333_s14   ;;  %s1086_s13 = sphi %s1122_s13, %s1332_s13   ;;  %s1082_s12 = sphi %s1120_s12, %s1331_s12  }
   0x4   : > { %s1145_s18 = sadd.s32 1, %s1094_s15   ;;  %s91_s19 = sadd.s32 1, %s1090_s14 }
   0x5   : > { %s88_s20 = ssub.s32 %s1094_s15, %s1145_s18  ;;  %p101_p0 = scmp.ne.s32.totalorder %s1090_s14, %s1086_s13 }
   0x6   : > { %p89_p1 = scmp.eq.s32.totalorder %s88_s20, 0  ;;  %p102_p2 = scmp.eq.s32.totalorder %s1141_s16, 1 }
   0x7   : > { %p107_p3 = scmp.ne.s32.totalorder %s1086_s13, %s1082_s12  ;;  %p108_p4 = scmp.eq.s32.totalorder %s846_s17, 1 }
   0x8   : > { %s1156_s21 = scalar_select %p89_p1, %s1090_s14, %s91_s19  }
   0x9   : > { %p1158_p5 = por %p102_p2, %p101_p0  ;;  %p1162_p6 = por %p108_p4, %p107_p3 }
   0xa   : > { %p849_p7 = scmp.ge.s32.totalorder %s1094_s15, 1  ;;  %p140_p8 = scmp.lt.s32.totalorder %s1094_s15, 3 }
   0xc   : > { %p141_p9 = pnand %p849_p7, %p140_p8 }
   0xd   : > { %v171_v0 = vld [vmem:[%s1326_s1] sm:$0xff] (!%p141_p9)  ;;  %v172_v1 = vld [vmem:[%s1326_s1 + $0x8] sm:$0xff] (!%p141_p9)  ;;  %v173_v2 = vld [vmem:[%s1326_s1 + $0x10] sm:$0xff] (!%p141_p9)  ;;  %p164_p10 = scmp.lt.s32.totalorder (!%p141_p9), %s1141_s16, 1  ;;  %vm179_vm0 = vcmask (!%p141_p9), 523264   ;;  %v1096_v20 = vmov (!%p141_p9), 0.0|0.0   ;;  %v366_v24 = vlaneseq (!%p141_p9) }
   0xe   : > { %144 = sbr.rel (%p141_p9) target bundleno = 2078 (0x81e), region = 32  ;;  %v919_v3 = vpack.c.bf16 (!%p141_p9), %v172_v1, %v171_v0  ;;  %v174_v4 = vld [vmem:[%s1326_s1 + $0x18] sm:$0xff] (!%p141_p9)  ;;  %v175_v6 = vld [vmem:[%s1326_s1 + $0x20] sm:$0xff] (!%p141_p9)  ;;  %v176_v7 = vld [vmem:[%s1326_s1 + $0x28] sm:$0xff] (!%p141_p9)  ;;  %vm265_vm1 = vcmask (!%p141_p9), 261120   ;;  %vm347_vm3 = vcmask (!%p141_p9), 72704  }
   0xf   : > { %v923_v5 = vpack.c.bf16 (!%p141_p9), %v174_v4, %v173_v2  ;;  %v261_v8 = vld [vmem:[%s1327_s2] sm:$0xff] (!%p141_p9)  ;;  %v262_v9 = vld [vmem:[%s1327_s2 + $0x8] sm:$0xff] (!%p141_p9)  ;;  %v263_v10 = vld [vmem:[%s1327_s2 + $0x10] sm:$0xff] (!%p141_p9)  ;;  %v927_v14 = vpack.c.bf16 (!%p141_p9), %v176_v7, %v175_v6  ;;  %v1213_v25 = vand.u32 (!%p141_p9), 127, %v366_v24  ;;  %v1222_v1 = vshrl.u32 (!%p141_p9), %v366_v24, 7 }
  0x10   : > { %920 = vmatprep.subr.bf16.mxu0 (!%p141_p9), %v919_v3  ;;  %v264_v11 = vld [vmem:[%s1327_s2 + $0x18] sm:$0xff] (!%p141_p9)  ;;  %v935_v12 = vpack.c.bf16 (!%p141_p9), %v262_v9, %v261_v8  ;;  %v177_v15 = vld [vmem:[%s1326_s1 + $0x30] sm:$0xff] (!%p141_p9) }
  0x11   : > { %922 = vmatpush3.bf16.msra.mxu0 (!%p141_p9), %v919_v3  ;;  %v939_v13 = vpack.c.bf16 (!%p141_p9), %v264_v11, %v263_v10  ;;  %v178_v16 = vld [vmem:[%s1326_s1 + $0x38] sm:$0xff] (!%p141_p9)  ;;  %vm368_vm2 = vcmp.lt.s32.totalorder (!%p141_p9), %v1213_v25, 8  ;;  %v1225_v2 = vadd.s32 (!%p141_p9), 8, %v1222_v1 }
  0x12   : > { %924 = vmatprep.subr.bf16.mxu0 (!%p141_p9), %v923_v5  ;;  %936 = vmatprep.subr.bf16.mxu1 (!%p141_p9), %v935_v12  ;;  %v931_v18 = vpack.c.bf16 (!%p141_p9), %v178_v16, %v177_v15 }
  0x13   : > { %938 = vmatpush3.bf16.msra.mxu1 (!%p141_p9), %v935_v12 }
  0x14   : > { %940 = vmatprep.subr.bf16.mxu1 (!%p141_p9), %v939_v13 }
  0x15   : > { %s165_s9 = scalar_select %p164_p10, %s1141_s16, 1  ;;  %926 = vmatpush3.bf16.msra.mxu0 %v923_v5 }
  0x16   : > { %928 = vmatprep.subr.bf16.mxu0 %v927_v14 }
  0x17   : > { %s862_s27 = sshll.u32 %s165_s9, 4  ;;  %942 = vmatpush3.bf16.msra.mxu1 %v939_v13 }
  0x18   : > { %s168_s30 = scalar_lea.vmem %s1325_s0, %s862_s27  ;;  %943 = vmatprep.subr.bf16.mxu1 %v1096_v20 }
  0x19   : > { %v169_v17 = vld [vmem:[%s168_s30] sm:$0xff]  ;;  %930 = vmatpush3.bf16.msra.mxu0 %v927_v14  ;;  %v170_v19 = vld [vmem:[%s168_s30 + $0x8] sm:$0xff] }
  0x1a   : > { %898 = vmatprep.mubr.msk.f32.mxu0 %vm179_vm0, %v169_v17  ;;  %932 = vmatprep.subr.bf16.mxu0 %v931_v18 }
  0x1d   : > { %934 = vmatpush3.bf16.msra.mxu0 %v931_v18 }
  0x20   : > { %899 = vmatmul.mubr.msk.f32.vlgmr.msra.gmra.mrb[0].mxu0 %vm179_vm0, %v170_v19 }
  0xf3   : > { %v900_v21 = vpop.f32.mrb[0].mxu0 }
  0xf4   : > { %v252_v22 = vpop.f32.mrb[1].mxu0 }
  0xf5   : > { %v944_v23 = vpack.c.bf16 %v900_v21, %v252_v22  ;;  %909 = vmatprep.mubr.msk.f32.mxu1 %vm265_vm1, %v252_v22 }
  0xf6   : > { %910 = vmatmul.mubr.msk.f32.vlgmr.msra.gmra.mrb[0].mxu1 %vm265_vm1, %v900_v21 }
  0xf7   : > { %945 = vmatpush3.bf16.msra.mxu1 %v944_v23 }
 0x1c9   : > { %v911_v26 = vpop.f32.mrb[0].mxu1 }
 0x1ca   : > { %v338_v27 = vpop.f32.mrb[1].mxu1  ;;  %v370_v28 = vsel %vm368_vm2, %v911_v26, -inf  ;;  %v351_v33 = vsel %vm347_vm3, %v911_v26, -inf }
 0x1cb   : > { %v374_v29 = vsel %vm347_vm3, %v370_v28, -inf  ;;  %v348_v30 = vsel %vm347_vm3, %v338_v27, -inf  ;;  %v369_v31 = vsel %vm368_vm2, %v338_v27, -inf }
 0x1cc   : > { %375 = vmax.xlane.f32.xlu1 %v374_v29  ;;  %349 = vmax.xlane.f32.xlu0 %v348_v30  ;;  %v371_v32 = vsel %vm347_vm3, %v369_v31, -inf }
 0x1d0   : > { %372 = vmax.xlane.f32.xlu1 %v371_v32  ;;  %352 = vmax.xlane.f32.xlu0 %v351_v33 }
 0x259   : > { %v350_v34 = vpop.xlane.xlu0 %349  ;;  %v376_v44 = vpop.xlane.xlu1 %375 }
 0x25a   : > { %v354_v35 = vsub.f32 %v338_v27, %v350_v34 }
 0x25c   : > { %v356_v36 = vmul.f32 1.442695, %v354_v35 }
 0x25d   : > { %v353_v37 = vpop.xlane.xlu0 %352  ;;  %v373_v45 = vpop.xlane.xlu1 %372 }
 0x25e   : > { %1020 = vpow2.f32 %v356_v36  ;;  %v355_v38 = vsub.f32 %v911_v26, %v353_v37  ;;  %v377_v46 = vsub.f32 %v373_v45, %v350_v34  ;;  %v378_v47 = vsub.f32 %v376_v44, %v353_v37 }
 0x260   : > { %v358_v39 = vmul.f32 1.442695, %v355_v38  ;;  %v379_v48 = vmul.f32 1.442695, %v377_v46  ;;  %v381_v49 = vmul.f32 1.442695, %v378_v47 }
 0x262   : > { %1022 = vpow2.f32 %v358_v39 }
 0x263   : > { %1024 = vpow2.f32 %v379_v48 }
 0x268   : > { %v1021_v40 = vpop.eup %1020 }
 0x269   : > { %v360_v41 = vsel %vm347_vm3, %v1021_v40, 0.0 }
 0x26a   : > { %361 = vadd.xlane.f32.xlu0 %v360_v41 }
 0x26c   : > { %v1023_v42 = vpop.eup %1022 }
 0x26d   : > { %v363_v43 = vsel %vm347_vm3, %v1023_v42, 0.0  ;;  %v1025_v52 = vpop.eup %1024  ;;  %vm418_vm3 = vcmp.eq.s32.totalorder %v1222_v1, 0 }
 0x26e   : > { %364 = vadd.xlane.f32.xlu1 %v363_v43 }
 0x2f7   : > { %v362_v50 = vpop.xlane.xlu0 %361 }
 0x2f8   : > { %1026 = vrcp.f32 %v362_v50 }
 0x2f9   : > { %1028 = vpow2.f32 %v381_v49 }
 0x2fb   : > { %v365_v51 = vpop.xlane.xlu1 %364 }
 0x2fc   : > { %1030 = vrcp.f32 %v365_v51 }
 0x302   : > { %v1027_v53 = vpop.eup %1026 }
 0x303   : > { %v1029_v54 = vpop.eup %1028  ;;  %v385_v56 = vmul.f32 %v1027_v53, %v1025_v52 }
 0x306   : > { %v1031_v55 = vpop.eup %1030 }
 0x307   : > { %v386_v57 = vmul.f32 %v1031_v55, %v1029_v54 }
 0x309   : > { %v390_v58 = vmax.f32 %v385_v56, %v386_v57 }
 0x30b   : > { %v391_v59 = vrot.slane %v390_v58, 4 }
 0x30d   : > { %v392_v60 = vmax.f32 %v390_v58, %v391_v59 }
 0x30f   : > { %v393_v61 = vrot.slane %v392_v60, 2 }
 0x311   : > { %v394_v62 = vmax.f32 %v392_v60, %v393_v61 }
 0x313   : > { %v395_v63 = vrot.slane %v394_v62, 1 }
 0x315   : > { %v396_v0 = vmax.f32 %v394_v62, %v395_v63 }
 0x317   : > { %946 = vpush %v396_v0 }
 0x348   : > { %s1227_s8 = spop %946 }
 0x349   : > { %v398_v3 = vstv %s1227_s8  ;;  %p415_p11 = scmp.ge.f32.partialorder %s1227_s8, 0.7 }
 0x34a   : > { %vm399_vm4 = vcmp.eq.f32.partialorder %v385_v56, %v398_v3  ;;  %vm400_vm5 = vcmp.eq.f32.partialorder %v386_v57, %v398_v3 }
 0x34b   : > { %v401_v4 = vsel %vm399_vm4, %v1222_v1, 16  ;;  %v402_v5 = vsel %vm400_vm5, %v1225_v2, 16  ;;  %s416_s11 = scalar_select %p415_p11, 1, 0  ;;  %vm457_vm5 = vcmp.eq.s32.totalorder %v1222_v1, 1 }
 0x34c   : > { %vm403_vm6 = vcmp.lt.s32.totalorder %v401_v4, %v402_v5 }
 0x34d   : > { %v404_v6 = vsel %vm403_vm6, %v401_v4, %v402_v5  ;;  %s417_s19 = scvt.s32.f32 %s416_s11 }
 0x34e   : > { %v405_v7 = vrot.slane %v404_v6, 4 }
 0x34f   : > { %v422_v35 = vstv %s417_s19 }
 0x350   : > { %vm406_vm7 = vcmp.lt.s32.totalorder %v404_v6, %v405_v7 }
 0x351   : > { %v407_v8 = vsel %vm406_vm7, %v404_v6, %v405_v7 }
 0x352   : > { %v408_v9 = vrot.slane %v407_v8, 2 }
 0x354   : > { %vm409_vm8 = vcmp.lt.s32.totalorder %v407_v8, %v408_v9 }
 0x355   : > { %v410_v10 = vsel %vm409_vm8, %v407_v8, %v408_v9 }
 0x356   : > { %v411_v11 = vrot.slane %v410_v10, 1 }
 0x358   : > { %vm412_vm9 = vcmp.lt.s32.totalorder %v410_v10, %v411_v11 }
 0x359   : > { %v413_v12 = vsel %vm412_vm9, %v410_v10, %v411_v11 }
 0x35a   : > { %948 = vpush %v413_v12 }
 0x38b   : > { %s949_s9 = spop %948 }
 0x38c   : > { %v419_v13 = vstv %s949_s9 }
 0x38d   : > { %vm425_vm10 = vcmp.eq.s32.totalorder %v1222_v1, %v419_v13  ;;  %vm426_vm11 = vcmp.eq.s32.totalorder %v1225_v2, %v419_v13  ;;  %vm420_vm4 = vcmp.eq.s32.totalorder %v1213_v25, %v419_v13 }
 0x38e   : > { %v427_v14 = vsel %vm425_vm10, -inf, %v385_v56  ;;  %v428_v15 = vsel %vm426_vm11, -inf, %v386_v57  ;;  %vm421_vm6 = vmand %vm418_vm3, %vm420_vm4 }
 0x38f   : > { %v429_v16 = vmax.f32 %v427_v14, %v428_v15  ;;  %v423_v39 = vsel %vm421_vm6, %v422_v35, 0.0 }
 0x391   : > { %v430_v17 = vrot.slane %v429_v16, 4 }
 0x393   : > { %v431_v18 = vmax.f32 %v429_v16, %v430_v17 }
 0x395   : > { %v432_v19 = vrot.slane %v431_v18, 2 }
 0x397   : > { %v433_v20 = vmax.f32 %v431_v18, %v432_v19 }
 0x399   : > { %v434_v21 = vrot.slane %v433_v20, 1 }
 0x39b   : > { %v435_v22 = vmax.f32 %v433_v20, %v434_v21 }
 0x39d   : > { %950 = vpush %v435_v22 }
 0x3ce   : > { %s951_s10 = spop %950 }
 0x3cf   : > { %v437_v23 = vstv %s951_s10  ;;  %p454_p12 = scmp.ge.f32.partialorder %s951_s10, 0.7 }
 0x3d0   : > { %vm438_vm12 = vcmp.eq.f32.partialorder %v427_v14, %v437_v23  ;;  %vm439_vm13 = vcmp.eq.f32.partialorder %v428_v15, %v437_v23 }
 0x3d1   : > { %v440_v24 = vsel %vm438_vm12, %v1222_v1, 16  ;;  %v441_v26 = vsel %vm439_vm13, %v1225_v2, 16  ;;  %s455_s17 = scalar_select %p454_p12, 1, 0 }
 0x3d2   : > { %vm442_vm14 = vcmp.lt.s32.totalorder %v440_v24, %v441_v26 }
 0x3d3   : > { %v443_v27 = vsel %vm442_vm14, %v440_v24, %v441_v26  ;;  %s456_s20 = scvt.s32.f32 %s455_s17 }
 0x3d4   : > { %v444_v28 = vrot.slane %v443_v27, 4 }
 0x3d5   : > { %v461_v36 = vstv %s456_s20 }
 0x3d6   : > { %vm445_vm15 = vcmp.lt.s32.totalorder %v443_v27, %v444_v28 }
 0x3d7   : > { %v446_v29 = vsel %vm445_vm15, %v443_v27, %v444_v28 }
 0x3d8   : > { %v447_v30 = vrot.slane %v446_v29, 2 }
 0x3da   : > { %vm448_vm0 = vcmp.lt.s32.totalorder %v446_v29, %v447_v30 }
 0x3db   : > { %v449_v31 = vsel %vm448_vm0, %v446_v29, %v447_v30 }
 0x3dc   : > { %v450_v32 = vrot.slane %v449_v31, 1 }
 0x3de   : > { %vm451_vm2 = vcmp.lt.s32.totalorder %v449_v31, %v450_v32 }
 0x3df   : > { %v452_v33 = vsel %vm451_vm2, %v449_v31, %v450_v32  ;;  %vm496_vm2 = vcmp.eq.s32.totalorder %v1222_v1, 2 }
 0x3e0   : > { %952 = vpush %v452_v33 }
 0x411   : > { %s953_s24 = spop %952 }
 0x412   : > { %v458_v34 = vstv %s953_s24 }
 0x413   : > { %vm459_vm7 = vcmp.eq.s32.totalorder %v1213_v25, %v458_v34  ;;  %vm464_vm8 = vcmp.eq.s32.totalorder %v1222_v1, %v458_v34  ;;  %vm465_vm9 = vcmp.eq.s32.totalorder %v1225_v2, %v458_v34 }
 0x414   : > { %vm460_vm10 = vmand %vm457_vm5, %vm459_vm7  ;;  %v466_v37 = vsel %vm464_vm8, -inf, %v427_v14  ;;  %v467_v38 = vsel %vm465_vm9, -inf, %v428_v15 }
 0x415   : > { %v462_v40 = vsel %vm460_vm10, %v461_v36, 0.0  ;;  %v468_v41 = vmax.f32 %v466_v37, %v467_v38 }
 0x416   : > { %v463_v42 = vadd.f32 %v462_v40, %v423_v39 }
 0x417   : > { %v469_v43 = vrot.slane %v468_v41, 4 }
 0x419   : > { %v470_v44 = vmax.f32 %v468_v41, %v469_v43 }
 0x41b   : > { %v471_v45 = vrot.slane %v470_v44, 2 }
 0x41d   : > { %v472_v46 = vmax.f32 %v470_v44, %v471_v45 }
 0x41f   : > { %v473_v47 = vrot.slane %v472_v46, 1 }
 0x421   : > { %v474_v48 = vmax.f32 %v472_v46, %v473_v47 }
 0x423   : > { %954 = vpush %v474_v48 }
 0x454   : > { %s955_s25 = spop %954 }
 0x455   : > { %v476_v49 = vstv %s955_s25  ;;  %p493_p13 = scmp.ge.f32.partialorder %s955_s25, 0.7 }
 0x456   : > { %vm477_vm11 = vcmp.eq.f32.partialorder %v466_v37, %v476_v49  ;;  %vm478_vm12 = vcmp.eq.f32.partialorder %v467_v38, %v476_v49 }
 0x457   : > { %v479_v50 = vsel %vm477_vm11, %v1222_v1, 16  ;;  %v480_v51 = vsel %vm478_vm12, %v1225_v2, 16  ;;  %s494_s26 = scalar_select %p493_p13, 1, 0 }
 0x458   : > { %vm481_vm13 = vcmp.lt.s32.totalorder %v479_v50, %v480_v51 }
 0x459   : > { %v482_v52 = vsel %vm481_vm13, %v479_v50, %v480_v51  ;;  %s495_s27 = scvt.s32.f32 %s494_s26  ;;  %vm535_vm13 = vcmp.eq.s32.totalorder %v1222_v1, 3 }
 0x45a   : > { %v483_v53 = vrot.slane %v482_v52, 4 }
 0x45b   : > { %v500_v60 = vstv %s495_s27 }
 0x45c   : > { %vm484_vm14 = vcmp.lt.s32.totalorder %v482_v52, %v483_v53 }
 0x45d   : > { %v485_v54 = vsel %vm484_vm14, %v482_v52, %v483_v53 }
 0x45e   : > { %v486_v55 = vrot.slane %v485_v54, 2 }
 0x460   : > { %vm487_vm15 = vcmp.lt.s32.totalorder %v485_v54, %v486_v55 }
 0x461   : > { %v488_v56 = vsel %vm487_vm15, %v485_v54, %v486_v55 }
 0x462   : > { %v489_v57 = vrot.slane %v488_v56, 1 }
 0x464   : > { %vm490_vm0 = vcmp.lt.s32.totalorder %v488_v56, %v489_v57 }
 0x465   : > { %v491_v58 = vsel %vm490_vm0, %v488_v56, %v489_v57 }
 0x466   : > { %956 = vpush %v491_v58 }
 0x497   : > { %s957_s28 = spop %956 }
 0x498   : > { %v497_v59 = vstv %s957_s28 }
 0x499   : > { %vm498_vm3 = vcmp.eq.s32.totalorder %v1213_v25, %v497_v59  ;;  %vm503_vm4 = vcmp.eq.s32.totalorder %v1222_v1, %v497_v59  ;;  %vm504_vm5 = vcmp.eq.s32.totalorder %v1225_v2, %v497_v59 }
 0x49a   : > { %vm499_vm6 = vmand %vm496_vm2, %vm498_vm3  ;;  %v505_v61 = vsel %vm503_vm4, -inf, %v466_v37  ;;  %v506_v62 = vsel %vm504_vm5, -inf, %v467_v38 }
 0x49b   : > { %v501_v63 = vsel %vm499_vm6, %v500_v60, 0.0  ;;  %v507_v0 = vmax.f32 %v505_v61, %v506_v62 }
 0x49c   : > { %v502_v3 = vadd.f32 %v501_v63, %v463_v42 }
 0x49d   : > { %v508_v4 = vrot.slane %v507_v0, 4 }
 0x49f   : > { %v509_v5 = vmax.f32 %v507_v0, %v508_v4 }
 0x4a1   : > { %v510_v6 = vrot.slane %v509_v5, 2 }
 0x4a3   : > { %v511_v7 = vmax.f32 %v509_v5, %v510_v6 }
 0x4a5   : > { %v512_v8 = vrot.slane %v511_v7, 1 }
 0x4a7   : > { %v513_v9 = vmax.f32 %v511_v7, %v512_v8 }
 0x4a9   : > { %958 = vpush %v513_v9 }
 0x4da   : > { %s959_s29 = spop %958 }
 0x4db   : > { %v515_v10 = vstv %s959_s29  ;;  %p532_p0 = scmp.ge.f32.partialorder %s959_s29, 0.7 }
 0x4dc   : > { %vm516_vm7 = vcmp.eq.f32.partialorder %v505_v61, %v515_v10  ;;  %vm517_vm8 = vcmp.eq.f32.partialorder %v506_v62, %v515_v10 }
 0x4dd   : > { %v518_v11 = vsel %vm516_vm7, %v1222_v1, 16  ;;  %v519_v12 = vsel %vm517_vm8, %v1225_v2, 16  ;;  %s533_s30 = scalar_select %p532_p0, 1, 0 }
 0x4de   : > { %vm520_vm9 = vcmp.lt.s32.totalorder %v518_v11, %v519_v12 }
 0x4df   : > { %v521_v13 = vsel %vm520_vm9, %v518_v11, %v519_v12  ;;  %s534_s4 = scvt.s32.f32 %s533_s30  ;;  %vm574_vm9 = vcmp.eq.s32.totalorder %v1222_v1, 4 }
 0x4e0   : > { %v522_v14 = vrot.slane %v521_v13, 4 }
 0x4e1   : > { %v539_v21 = vstv %s534_s4  ;;  %s161_s4 = sand.u32 1, %s1086_s13  }
 0x4e2   : > { %vm523_vm10 = vcmp.lt.s32.totalorder %v521_v13, %v522_v14 }
 0x4e3   : > { %v524_v15 = vsel %vm523_vm10, %v521_v13, %v522_v14 }
 0x4e4   : > { %v525_v16 = vrot.slane %v524_v15, 2 }
 0x4e6   : > { %vm526_vm11 = vcmp.lt.s32.totalorder %v524_v15, %v525_v16 }
 0x4e7   : > { %v527_v17 = vsel %vm526_vm11, %v524_v15, %v525_v16 }
 0x4e8   : > { %v528_v18 = vrot.slane %v527_v17, 1 }
 0x4ea   : > { %vm529_vm12 = vcmp.lt.s32.totalorder %v527_v17, %v528_v18 }
 0x4eb   : > { %v530_v19 = vsel %vm529_vm12, %v527_v17, %v528_v18 }
 0x4ec   : > { %960 = vpush %v530_v19 }
 0x51d   : > { %s961_s5 = spop %960 }
 0x51e   : > { %v536_v20 = vstv %s961_s5  ;;  %s850_s5 = sshll.u32 %s161_s4, 3 }
 0x51f   : > { %vm537_vm14 = vcmp.eq.s32.totalorder %v1213_v25, %v536_v20  ;;  %vm542_vm15 = vcmp.eq.s32.totalorder %v1222_v1, %v536_v20  ;;  %vm543_vm0 = vcmp.eq.s32.totalorder %v1225_v2, %v536_v20 }
 0x520   : > { %vm538_vm2 = vmand %vm535_vm13, %vm537_vm14  ;;  %v544_v22 = vsel %vm542_vm15, -inf, %v505_v61  ;;  %v545_v23 = vsel %vm543_vm0, -inf, %v506_v62 }
 0x521   : > { %v540_v24 = vsel %vm538_vm2, %v539_v21, 0.0  ;;  %v546_v26 = vmax.f32 %v544_v22, %v545_v23 }
 0x522   : > { %v541_v27 = vadd.f32 %v540_v24, %v502_v3 }
 0x523   : > { %v547_v28 = vrot.slane %v546_v26, 4 }
 0x525   : > { %v548_v29 = vmax.f32 %v546_v26, %v547_v28 }
 0x527   : > { %v549_v30 = vrot.slane %v548_v29, 2 }
 0x529   : > { %v550_v31 = vmax.f32 %v548_v29, %v549_v30 }
 0x52b   : > { %v551_v32 = vrot.slane %v550_v31, 1 }
 0x52d   : > { %v552_v33 = vmax.f32 %v550_v31, %v551_v32 }
 0x52f   : > { %962 = vpush %v552_v33 }
 0x560   : > { %s963_s6 = spop %962 }
 0x561   : > { %v554_v34 = vstv %s963_s6  ;;  %p571_p1 = scmp.ge.f32.partialorder %s963_s6, 0.7  ;;  %s859_s6 = sshll.u32 %s1141_s16, 7 }
 0x562   : > { %vm555_vm3 = vcmp.eq.f32.partialorder %v544_v22, %v554_v34  ;;  %vm556_vm4 = vcmp.eq.f32.partialorder %v545_v23, %v554_v34  ;;  %s1099_s16 = smov [#allocation2]  }
 0x563   : > { %v557_v35 = vsel %vm555_vm3, %v1222_v1, 16  ;;  %v558_v36 = vsel %vm556_vm4, %v1225_v2, 16  ;;  %s572_s7 = scalar_select %p571_p1, 1, 0 }
 0x564   : > { %vm559_vm5 = vcmp.lt.s32.totalorder %v557_v35, %v558_v36 }
 0x565   : > { %v560_v37 = vsel %vm559_vm5, %v557_v35, %v558_v36  ;;  %s573_s8 = scvt.s32.f32 %s572_s7  ;;  %vm613_vm5 = vcmp.eq.s32.totalorder %v1222_v1, 5  ;;  %s163_s7 = scalar_lea.vmem [#allocation2], %s850_s5 }
 0x566   : > { %v561_v38 = vrot.slane %v560_v37, 4 }
 0x567   : > { %v578_v45 = vstv %s573_s8  ;;  %s787_s8 = sshll.u32 %s163_s7, 4  ;;  %s1284_s8 = int_to_ptr.vmem [resolvable:$true] %s787_s8 }
 0x568   : > { %vm562_vm6 = vcmp.lt.s32.totalorder %v560_v37, %v561_v38 }
 0x569   : > { %v563_v39 = vsel %vm562_vm6, %v560_v37, %v561_v38 }
 0x56a   : > { %v564_v40 = vrot.slane %v563_v39, 2 }
 0x56c   : > { %vm565_vm7 = vcmp.lt.s32.totalorder %v563_v39, %v564_v40 }
 0x56d   : > { %v566_v41 = vsel %vm565_vm7, %v563_v39, %v564_v40  ;;  %v1098_v40 = vmov 0.0  }
 0x56e   : > { %v567_v42 = vrot.slane %v566_v41, 1 }
 0x570   : > { %vm568_vm8 = vcmp.lt.s32.totalorder %v566_v41, %v567_v42 }
 0x571   : > { %v569_v43 = vsel %vm568_vm8, %v566_v41, %v567_v42 }
 0x572   : > { %964 = vpush %v569_v43 }
 0x5a3   : > { %s965_s9 = spop %964 }
 0x5a4   : > { %v575_v44 = vstv %s965_s9 }
 0x5a5   : > { %vm576_vm10 = vcmp.eq.s32.totalorder %v1213_v25, %v575_v44  ;;  %vm581_vm11 = vcmp.eq.s32.totalorder %v1222_v1, %v575_v44  ;;  %vm582_vm12 = vcmp.eq.s32.totalorder %v1225_v2, %v575_v44 }
 0x5a6   : > { %vm577_vm13 = vmand %vm574_vm9, %vm576_vm10  ;;  %v583_v46 = vsel %vm581_vm11, -inf, %v544_v22  ;;  %v584_v47 = vsel %vm582_vm12, -inf, %v545_v23 }
 0x5a7   : > { %v579_v48 = vsel %vm577_vm13, %v578_v45, 0.0  ;;  %v585_v49 = vmax.f32 %v583_v46, %v584_v47 }
 0x5a8   : > { %v580_v50 = vadd.f32 %v579_v48, %v541_v27 }
 0x5a9   : > { %v586_v51 = vrot.slane %v585_v49, 4 }
 0x5ab   : > { %v587_v52 = vmax.f32 %v585_v49, %v586_v51 }
 0x5ad   : > { %v588_v53 = vrot.slane %v587_v52, 2 }
 0x5af   : > { %v589_v54 = vmax.f32 %v587_v52, %v588_v53 }
 0x5b1   : > { %v590_v55 = vrot.slane %v589_v54, 1 }
 0x5b3   : > { %v591_v56 = vmax.f32 %v589_v54, %v590_v55 }
 0x5b5   : > { %966 = vpush %v591_v56 }
 0x5e6   : > { %s967_s10 = spop %966 }
 0x5e7   : > { %v593_v57 = vstv %s967_s10  ;;  %p610_p2 = scmp.ge.f32.partialorder %s967_s10, 0.7 }
 0x5e8   : > { %vm594_vm14 = vcmp.eq.f32.partialorder %v583_v46, %v593_v57  ;;  %vm595_vm15 = vcmp.eq.f32.partialorder %v584_v47, %v593_v57 }
 0x5e9   : > { %v596_v58 = vsel %vm594_vm14, %v1222_v1, 16  ;;  %v597_v59 = vsel %vm595_vm15, %v1225_v2, 16  ;;  %s611_s11 = scalar_select %p610_p2, 1, 0 }
 0x5ea   : > { %vm598_vm0 = vcmp.lt.s32.totalorder %v596_v58, %v597_v59 }
 0x5eb   : > { %v599_v60 = vsel %vm598_vm0, %v596_v58, %v597_v59  ;;  %s612_s17 = scvt.s32.f32 %s611_s11  ;;  %vm652_vm0 = vcmp.eq.s32.totalorder %v1222_v1, 6  ;;  %s1282_s11 = scalar_lea.hbm %s1328_s3, %s859_s6 }
 0x5ec   : > { %v600_v61 = vrot.slane %v599_v60, 4 }
 0x5ed   : > { %v617_v6 = vstv %s612_s17  ;;  %s774_s17 = scalar_lea.sflag [#allocation3], %s161_s4 }
 0x5ee   : > { %vm601_vm2 = vcmp.lt.s32.totalorder %v599_v60, %v600_v61 }
 0x5ef   : > { %v602_v62 = vsel %vm601_vm2, %v599_v60, %v600_v61 }
 0x5f0   : > { %v603_v63 = vrot.slane %v602_v62, 2 }
 0x5f2   : > { %vm604_vm3 = vcmp.lt.s32.totalorder %v602_v62, %v603_v63 }
 0x5f3   : > { %v605_v0 = vsel %vm604_vm3, %v602_v62, %v603_v63 }
 0x5f4   : > { %v606_v3 = vrot.slane %v605_v0, 1 }
 0x5f6   : > { %vm607_vm4 = vcmp.lt.s32.totalorder %v605_v0, %v606_v3 }
 0x5f7   : > { %v608_v4 = vsel %vm607_vm4, %v605_v0, %v606_v3 }
 0x5f8   : > { %968 = vpush %v608_v4 }
 0x629   : > { %s969_s19 = spop %968 }
 0x62a   : > { %v614_v5 = vstv %s969_s19  ;;  %s1032_s19 = scalar_lea.vmem %s1284_s8, 128 }
 0x62b   : > { %vm615_vm6 = vcmp.eq.s32.totalorder %v1213_v25, %v614_v5  ;;  %vm620_vm7 = vcmp.eq.s32.totalorder %v1222_v1, %v614_v5  ;;  %vm621_vm8 = vcmp.eq.s32.totalorder %v1225_v2, %v614_v5  ;;  %p1033_p7 = scmp.ne.s32.totalorder %s1284_s8, %s1032_s19 }
 0x62c   : > { %vm616_vm9 = vmand %vm613_vm5, %vm615_vm6  ;;  %v622_v7 = vsel %vm620_vm7, -inf, %v583_v46  ;;  %v623_v8 = vsel %vm621_vm8, -inf, %v584_v47  ;;  %vm1097_vm6 = vmmov 0  }
 0x62d   : > { %v618_v9 = vsel %vm616_vm9, %v617_v6, 0.0  ;;  %v624_v10 = vmax.f32 %v622_v7, %v623_v8  ;;  %916 = vmatprep.mubr.msk.f32.mxu1 %vm1097_vm6, %v1098_v40  ;;  %p1034_p8 = pnand %p1033_p7, %p1158_p5 }
 0x62e   : > { %v619_v11 = vadd.f32 %v618_v9, %v580_v50 }
 0x62f   : > { %v625_v12 = vrot.slane %v624_v10, 4  ;;  %p1035_p9 = pneg %p1034_p8 }
 0x631   : > { %v626_v13 = vmax.f32 %v624_v10, %v625_v12 }
 0x633   : > { %v627_v14 = vrot.slane %v626_v13, 2 }
 0x635   : > { %v628_v15 = vmax.f32 %v626_v13, %v627_v14 }
 0x637   : > { %v629_v16 = vrot.slane %v628_v15, 1 }
 0x639   : > { %v630_v17 = vmax.f32 %v628_v15, %v629_v16 }
 0x63b   : > { %970 = vpush %v630_v17 }
 0x66c   : > { %s971_s20 = spop %970 }
 0x66d   : > { %v632_v18 = vstv %s971_s20  ;;  %p649_p3 = scmp.ge.f32.partialorder %s971_s20, 0.7  ;;  %s1036_s20 = sshll.u32 %s1099_s16, 4  ;;  %s1037_s20 = int_to_ptr.vmem [resolvable:$false] %s1036_s20 }
 0x66e   : > { %vm633_vm10 = vcmp.eq.f32.partialorder %v622_v7, %v632_v18  ;;  %vm634_vm11 = vcmp.eq.f32.partialorder %v623_v8, %v632_v18  ;;  %p1039_p10 = scmp.lt.s32.totalorder %s1284_s8, %s1037_s20 }
 0x66f   : > { %v635_v19 = vsel %vm633_vm10, %v1222_v1, 16  ;;  %v636_v20 = vsel %vm634_vm11, %v1225_v2, 16  ;;  %s650_s24 = scalar_select %p649_p3, 1, 0 }
 0x670   : > { %vm637_vm12 = vcmp.lt.s32.totalorder %v635_v19, %v636_v20 }
 0x671   : > { %v638_v21 = vsel %vm637_vm12, %v635_v19, %v636_v20  ;;  %s651_s25 = scvt.s32.f32 %s650_s24  ;;  %s1038_s24 = scalar_lea.vmem %s1037_s20, 256 }
 0x672   : > { %v639_v22 = vrot.slane %v638_v21, 4  ;;  %p1040_p11 = scmp.lt.s32.totalorder %s1038_s24, %s1032_s19 }
 0x673   : > { %v656_v30 = vstv %s651_s25 }
 0x674   : > { %vm640_vm13 = vcmp.lt.s32.totalorder %v638_v21, %v639_v22  ;;  %p1041_p12 = por %p1040_p11, %p1039_p10 }
 0x675   : > { %v641_v23 = vsel %vm640_vm13, %v638_v21, %v639_v22  ;;  %vm691_vm13 = vcmp.eq.s32.totalorder %v1222_v1, 7 }
 0x676   : > { %v642_v24 = vrot.slane %v641_v23, 2  ;;  %p1042_p13 = pnand %p1041_p12, %p1035_p9 }
 0x678   : > { %vm643_vm14 = vcmp.lt.s32.totalorder %v641_v23, %v642_v24 }
 0x679   : > { %v644_v26 = vsel %vm643_vm14, %v641_v23, %v642_v24 }
 0x67a   : > { %v645_v27 = vrot.slane %v644_v26, 1 }
 0x67c   : > { %vm646_vm15 = vcmp.lt.s32.totalorder %v644_v26, %v645_v27 }
 0x67d   : > { %v647_v28 = vsel %vm646_vm15, %v644_v26, %v645_v27 }
 0x67e   : > { %972 = vpush %v647_v28 }
 0x6af   : > { %s973_s26 = spop %972 }
 0x6b0   : > { %v653_v29 = vstv %s973_s26 }
 0x6b1   : > { %vm654_vm2 = vcmp.eq.s32.totalorder %v1213_v25, %v653_v29  ;;  %vm659_vm3 = vcmp.eq.s32.totalorder %v1222_v1, %v653_v29  ;;  %vm660_vm4 = vcmp.eq.s32.totalorder %v1225_v2, %v653_v29 }
 0x6b2   : > { %vm655_vm5 = vmand %vm652_vm0, %vm654_vm2  ;;  %v661_v31 = vsel %vm659_vm3, -inf, %v622_v7  ;;  %v662_v32 = vsel %vm660_vm4, -inf, %v623_v8  ;;  %vm698_vm0 = vcmask 130048  }
 0x6b3   : > { %v657_v33 = vsel %vm655_vm5, %v656_v30, 0.0  ;;  %v663_v34 = vmax.f32 %v661_v31, %v662_v32 }
 0x6b4   : > { %v658_v35 = vadd.f32 %v657_v33, %v619_v11 }
 0x6b5   : > { %v664_v36 = vrot.slane %v663_v34, 4 }
 0x6b7   : > { %v665_v37 = vmax.f32 %v663_v34, %v664_v36 }
 0x6b9   : > { %v666_v38 = vrot.slane %v665_v37, 2 }
 0x6bb   : > { %v667_v39 = vmax.f32 %v665_v37, %v666_v38 }
 0x6bd   : > { %v668_v41 = vrot.slane %v667_v39, 1 }
 0x6bf   : > { %v669_v42 = vmax.f32 %v667_v39, %v668_v41 }
 0x6c1   : > { %974 = vpush %v669_v42 }
 0x6f2   : > { %s975_s27 = spop %974 }
 0x6f3   : > { %v671_v43 = vstv %s975_s27  ;;  %p688_p4 = scmp.ge.f32.partialorder %s975_s27, 0.7 }
 0x6f4   : > { %vm672_vm7 = vcmp.eq.f32.partialorder %v661_v31, %v671_v43  ;;  %vm673_vm8 = vcmp.eq.f32.partialorder %v662_v32, %v671_v43 }
 0x6f5   : > { %v674_v44 = vsel %vm672_vm7, %v1222_v1, 16  ;;  %v675_v45 = vsel %vm673_vm8, %v1225_v2, 16  ;;  %s689_s28 = scalar_select %p688_p4, 1, 0 }
 0x6f6   : > { %vm676_vm9 = vcmp.lt.s32.totalorder %v674_v44, %v675_v45 }
 0x6f7   : > { %v677_v46 = vsel %vm676_vm9, %v674_v44, %v675_v45  ;;  %s690_s29 = scvt.s32.f32 %s689_s28 }
 0x6f8   : > { %v678_v47 = vrot.slane %v677_v46, 4 }
 0x6f9   : > { %v695_v53 = vstv %s690_s29 }
 0x6fa   : > { %vm679_vm10 = vcmp.lt.s32.totalorder %v677_v46, %v678_v47 }
 0x6fb   : > { %v680_v48 = vsel %vm679_vm10, %v677_v46, %v678_v47 }
 0x6fc   : > { %v681_v49 = vrot.slane %v680_v48, 2 }
 0x6fe   : > { %vm682_vm11 = vcmp.lt.s32.totalorder %v680_v48, %v681_v49 }
 0x6ff   : > { %v683_v50 = vsel %vm682_vm11, %v680_v48, %v681_v49 }
 0x700   : > { %v684_v51 = vrot.slane %v683_v50, 1 }
 0x702   : > { %vm685_vm12 = vcmp.lt.s32.totalorder %v683_v50, %v684_v51 }
 0x703   : > { %v686_v52 = vsel %vm685_vm12, %v683_v50, %v684_v51 }
 0x704   : > { %976 = vpush %v686_v52 }
 0x735   : > { %s977_s30 = spop %976 }
 0x736   : > { %v692_v2 = vstv %s977_s30 }
 0x737   : > { %vm693_vm14 = vcmp.eq.s32.totalorder %v1213_v25, %v692_v2 }
 0x738   : > { %vm694_vm15 = vmand %vm691_vm13, %vm693_vm14 }
 0x739   : > { %v696_v54 = vsel %vm694_vm15, %v695_v53, 0.0 }
 0x73a   : > { %v697_v55 = vadd.f32 %v696_v54, %v658_v35 }
 0x73c   : > { %917 = vmatmul.mubr.msk.f32.vlgmr.msra.gmra.mrb[2].mxu1 %vm698_vm0, %v697_v55 }
 0x80f   : > { %v768_v25 = vpop.f32.mrb[2].mxu1 }
 0x810   : > { %772 = vst.msk [vmem:[%s163_s7] sm:$0xff] %vm265_vm1, %v768_v25  ;;  %v918_v1 = vpop.f32.mrb[3].mxu1 }
 0x811   : > { %1045 = shalt.err (!%p1042_p13)
}
 0x812   : > { %s1046_s25 = scalar_lea.hbm %s1282_s11, 128  ;;  %s1050_s28 = scalar_lea.hbm %s1328_s3, 256 }
 0x813   : > { %p1047_p0 = scmp.ne.s32.totalorder %s1282_s11, %s1046_s25  ;;  %p1051_p3 = scmp.lt.u32.totalorder %s1282_s11, %s1328_s3 }
 0x814   : > { %p1052_p4 = scmp.lt.u32.totalorder %s1050_s28, %s1046_s25  ;;  %p1054_p8 = scmp.lt.u32.totalorder %s1046_s25, %s1282_s11 }
 0x815   : > { %p1048_p1 = pnand %p1047_p0, %p1158_p5 }
 0x816   : > { %p1053_p7 = por %p1052_p4, %p1051_p3 }
 0x817   : > { %p1049_p2 = pneg %p1048_p1 }
 0x818   : > { %p1055_p9 = por %p1054_p8, %p1053_p7 }
 0x81a   : > { %p1056_p10 = pnand %p1055_p9, %p1049_p2 }
 0x81c   : > { %1059 = shalt.err (!%p1056_p10)
}
 0x81d   : > { %978 = dma.vmem_to_hbm [thread:$0]  (%p1158_p5), %s1284_s8, 128, %s1282_s11, %s774_s17  }
 0x81e PF: > { %p984_p11 = scmp.ge.s32.totalorder %s1094_s15, 2  ;;  %s799_s4 = sand.u32 1, %s1082_s12  }
 0x81f   : > { %s800_s5 = scalar_lea.sflag [#allocation3], %s799_s4 }
 0x820   : > { %p981_p12 = pnand %p984_p11, %p1162_p6 }
 0x822   : > { %1077 = dma.done.wait (!%p981_p12), %s800_s5, 128  }
 0x823   : > { %1079 = vsyncadd (!%p981_p12), %s800_s5, 4294967168  ;;  %p13_p13 = scmp.ge.s32.totalorder %s1145_s18, 4   ;;  %s1331_s12 = smov %s1086_s13 }
 0x824   : > { %s1332_s13 = smov %s1090_s14  ;;  %s1333_s14 = smov %s1156_s21 }
 0x825   : > { %s1334_s15 = smov %s1145_s18  ;;  %15 = sbr.rel (!%p13_p13) target bundleno = 3 (0x3), region = 67 }
 0x82c   :  { %805 = vsyncpa [#allocation3], 1 }
 0x82d   :  { %807 = vsyncpa [#allocation3 + $0x1], 1 }

</bundles_post_ra>
